<compile_context>
chip_gen: v7x
topology: tpu7x:2x2x1
jax: 0.10.0
libtpu: 0.0.40
codegen_flags: <defaults>
</compile_context>

<pallas_src>
import jax
import jax.numpy as jnp
from jax.experimental import pallas as pl
from jax.experimental.pallas import tpu as pltpu

H1 = 516      # fc1 out features (as in the PyTorch module)
H2 = 256      # fc2 out features
OUT = 1       # fc3 out features
H1P = 640     # H1 rounded up to a multiple of 128 (exact zero-padding)
MAX_TB = 1024  # batch-tile cap: safe on v5e/v6e/v7x VMEM budgets


def _round_up(x, m):
    return ((x + m - 1) // m) * m


def mlp_kernel(x_ref, w1_ref, b1_ref, w2_ref, b2_ref, w3_ref, b3_ref, o_ref):
    # fc1 + ReLU  (bf16 operands on the MXU, f32 accumulation; bias/ReLU in f32)
    x = x_ref[...].astype(jnp.bfloat16)
    h1 = jnp.dot(x, w1_ref[...], preferred_element_type=jnp.float32)
    h1 = jnp.maximum(h1 + b1_ref[...], 0.0)
    # fc2 + ReLU
    h2 = jnp.dot(h1.astype(jnp.bfloat16), w2_ref[...],
                 preferred_element_type=jnp.float32)
    h2 = jnp.maximum(h2 + b2_ref[...], 0.0)
    # fc3: single output column -> f32 broadcast-multiply + lane-reduce
    # (VPU/XLU; no zero-padded MXU matmul, no 128-wide output slab).
    col = jnp.sum(h2 * w3_ref[...], axis=-1, keepdims=True) + b3_ref[...]
    o_ref[...] = col.astype(o_ref.dtype)


def prepare_params(torch_params):
    """PyTorch-layout ((out,in) W, (out,) b) -> padded/transposed kernel params."""
    (w1, b1), (w2, b2), (w3, b3) = torch_params
    d_in = w1.shape[1]
    w1p = jnp.zeros((d_in, H1P), jnp.bfloat16).at[:, :H1].set(
        w1.T.astype(jnp.bfloat16))
    b1p = jnp.zeros((1, H1P), jnp.float32).at[:, :H1].set(
        b1.reshape(1, H1).astype(jnp.float32))
    w2p = jnp.zeros((H1P, H2), jnp.bfloat16).at[:H1, :].set(
        w2.T.astype(jnp.bfloat16))
    b2p = b2.reshape(1, H2).astype(jnp.float32)
    # fc3 row + bias kept in full f32 (only ~1 KiB) -> f32-exact final layer.
    w3p = w3.reshape(1, H2).astype(jnp.float32)
    b3p = b3.reshape(1, OUT).astype(jnp.float32)
    return w1p, b1p, w2p, b2p, w3p, b3p


def _choose_tile(B):
    # Target ~ceil(B/2) rows per step (>=2 grid steps whenever B > 8, so both
    # v7x TensorCores get work), rounded up to the 8-row sublane granule and
    # capped at MAX_TB (VMEM-safe on v5e/v6e/v7x).
    tb = min(MAX_TB, _round_up(max(pl.cdiv(B, 2), 1), 8))
    return max(tb, 8)


@jax.jit
def mlp_forward(x, kernel_params):
    w1, b1, w2, b2, w3, b3 = kernel_params
    B, D = x.shape

    TB = _choose_tile(B)
    BP = _round_up(B, TB)
    if BP != B:
        x = jnp.pad(x, ((0, BP - B), (0, 0)))

    grid = (BP // TB,)

    # Advisory cost estimate reflecting the padded work actually performed.
    flops = 2 * BP * (D * H1P + H1P * H2 + H2 * OUT)
    bytes_accessed = (
        BP * D * 4                                   # x (f32) read
        + (D * H1P + H1P * H2) * 2                   # bf16 weights
        + (H1P + H2) * 4                             # f32 biases
        + (H2 + OUT) * 4                             # f32 fc3 row + bias
        + BP * OUT * 4                               # f32 output column
    )

    grid_spec = pltpu.PrefetchScalarGridSpec(
        num_scalar_prefetch=0,
        grid=grid,
        in_specs=[
            pl.BlockSpec((TB, D), lambda i: (i, 0)),    # x tile marches over batch
            pl.BlockSpec((D, H1P), lambda i: (0, 0)),   # weights stay VMEM-resident
            pl.BlockSpec((1, H1P), lambda i: (0, 0)),
            pl.BlockSpec((H1P, H2), lambda i: (0, 0)),
            pl.BlockSpec((1, H2), lambda i: (0, 0)),
            pl.BlockSpec((1, H2), lambda i: (0, 0)),
            pl.BlockSpec((1, OUT), lambda i: (0, 0)),
        ],
        out_specs=pl.BlockSpec((TB, OUT), lambda i: (i, 0)),
    )

    out_padded = pl.pallas_call(
        mlp_kernel,
        out_shape=jax.ShapeDtypeStruct((BP, OUT), jnp.float32),
        grid_spec=grid_spec,
        compiler_params=pltpu.CompilerParams(
            dimension_semantics=("parallel",),
            vmem_limit_bytes=32 * 1024 * 1024),
        cost_estimate=pl.CostEstimate(
            flops=flops, transcendentals=0, bytes_accessed=bytes_accessed),
    )(x, w1, b1, w2, b2, w3, b3)

    return out_padded[:B]


def init_params(key, input_size):
    """Deterministic init mimicking nn.Linear default: U(-1/sqrt(fan_in), +...)."""
    dims = [(input_size, H1), (H1, H2), (H2, OUT)]
    params = []
    for fan_in, fan_out in dims:
        kw, kb, key = jax.random.split(key, 3)
        bound = 1.0 / jnp.sqrt(jnp.float32(fan_in))
        w = jax.random.uniform(kw, (fan_out, fan_in), jnp.float32, -bound, bound)
        b = jax.random.uniform(kb, (fan_out,), jnp.float32, -bound, bound)
        params.append((w, b))
    return params


def reference_forward(x, torch_params):
    (w1, b1), (w2, b2), (w3, b3) = torch_params
    h1 = jnp.maximum(x @ w1.T + b1, 0.0)
    h2 = jnp.maximum(h1 @ w2.T + b2, 0.0)
    return h2 @ w3.T + b3


if __name__ == "__main__":
    key = jax.random.PRNGKey(0)
    input_size = 32

    kx, kx2, kp = jax.random.split(key, 3)
    torch_params = init_params(kp, input_size)
    kernel_params = prepare_params(torch_params)

    # Small demo batch (single grid step path).
    batch = 8
    x = jax.random.normal(kx, (batch, input_size), jnp.float32)
    out = jax.block_until_ready(mlp_forward(x, kernel_params))
    ref = reference_forward(x, torch_params)
    assert out.shape == (batch, 1), out.shape
    # bf16 weights/activations on the MXU (fc3 in f32) -> relaxed tolerance vs f32 ref.
    assert jnp.allclose(out, ref, atol=3e-2, rtol=3e-2), (
        jnp.max(jnp.abs(out - ref)))

    # Larger batch: exercises batch padding and the >=2-step parallel grid.
    batch2 = 300
    x2 = jax.random.normal(kx2, (batch2, input_size), jnp.float32)
    out2 = jax.block_until_ready(mlp_forward(x2, kernel_params))
    ref2 = reference_forward(x2, torch_params)
    assert out2.shape == (batch2, 1), out2.shape
    assert jnp.allclose(out2, ref2, atol=3e-2, rtol=3e-2), (
        jnp.max(jnp.abs(out2 - ref2)))

    print("KERNEL_OK")
</pallas_src>

<mosaic_0001>
module attributes {stable_mosaic.version = 11 : i64} {
  func.func @mlp_kernel(%arg0: i32, %arg1: memref<8x32xf32, #tpu.memory_space<vmem>>, %arg2: memref<32x640xbf16, #tpu.memory_space<vmem>>, %arg3: memref<1x640xf32, #tpu.memory_space<vmem>>, %arg4: memref<640x256xbf16, #tpu.memory_space<vmem>>, %arg5: memref<1x256xf32, #tpu.memory_space<vmem>>, %arg6: memref<1x256xf32, #tpu.memory_space<vmem>>, %arg7: memref<1x1xf32, #tpu.memory_space<vmem>>, %arg8: memref<8x1xf32, #tpu.memory_space<vmem>>) attributes {dimension_semantics = [#tpu.dimension_semantics<parallel>], iteration_bounds = array<i64: 1>, scalar_prefetch = 0 : i64, scratch_operands = 0 : i64, tpu.core_type = #tpu.core_type<tc>, window_params = [{transform_indices = @transform_0, window_bounds = array<i64: 8, 32>}, {pipeline_mode = #tpu.pipeline_mode<synchronous>, transform_indices = @transform_1, window_bounds = array<i64: 32, 640>}, {pipeline_mode = #tpu.pipeline_mode<synchronous>, transform_indices = @transform_2, window_bounds = array<i64: 1, 640>}, {pipeline_mode = #tpu.pipeline_mode<synchronous>, transform_indices = @transform_3, window_bounds = array<i64: 640, 256>}, {pipeline_mode = #tpu.pipeline_mode<synchronous>, transform_indices = @transform_4, window_bounds = array<i64: 1, 256>}, {pipeline_mode = #tpu.pipeline_mode<synchronous>, transform_indices = @transform_5, window_bounds = array<i64: 1, 256>}, {pipeline_mode = #tpu.pipeline_mode<synchronous>, transform_indices = @transform_6, window_bounds = array<i64: 1, 1>}, {transform_indices = @transform_7, window_bounds = array<i64: 8, 1>}]} {
    %c0 = arith.constant 0 : index
    %c0_0 = arith.constant 0 : index
    %0 = vector.load %arg1[%c0, %c0_0] : memref<8x32xf32, #tpu.memory_space<vmem>>, vector<8x32xf32>
    %1 = arith.truncf %0 : vector<8x32xf32> to vector<8x32xbf16>
    %c0_1 = arith.constant 0 : index
    %c0_2 = arith.constant 0 : index
    %2 = vector.load %arg2[%c0_1, %c0_2] : memref<32x640xbf16, #tpu.memory_space<vmem>>, vector<32x640xbf16>
    %cst = arith.constant dense<0.000000e+00> : vector<8x640xf32>
    %3 = tpu.matmul %1, %2, %cst {dimension_numbers = #tpu.dot_dimension_numbers<[1], [0], [0], [1], [0, 0, 1, 1], [], []>} : vector<8x32xbf16>, vector<32x640xbf16>, vector<8x640xf32> -> vector<8x640xf32>
    %c0_3 = arith.constant 0 : index
    %c0_4 = arith.constant 0 : index
    %4 = vector.load %arg3[%c0_3, %c0_4] : memref<1x640xf32, #tpu.memory_space<vmem>>, vector<1x640xf32>
    %5 = vector.broadcast %4 : vector<1x640xf32> to vector<8x640xf32>
    %6 = arith.addf %3, %5 : vector<8x640xf32>
    %cst_5 = arith.constant 0.000000e+00 : f32
    %7 = vector.broadcast %cst_5 : f32 to vector<8x640xf32>
    %8 = arith.maximumf %6, %7 : vector<8x640xf32>
    %9 = arith.truncf %8 : vector<8x640xf32> to vector<8x640xbf16>
    %c0_6 = arith.constant 0 : index
    %c0_7 = arith.constant 0 : index
    %10 = vector.load %arg4[%c0_6, %c0_7] : memref<640x256xbf16, #tpu.memory_space<vmem>>, vector<640x256xbf16>
    %cst_8 = arith.constant dense<0.000000e+00> : vector<8x256xf32>
    %11 = tpu.matmul %9, %10, %cst_8 {dimension_numbers = #tpu.dot_dimension_numbers<[1], [0], [0], [1], [0, 0, 1, 1], [], []>} : vector<8x640xbf16>, vector<640x256xbf16>, vector<8x256xf32> -> vector<8x256xf32>
    %c0_9 = arith.constant 0 : index
    %c0_10 = arith.constant 0 : index
    %12 = vector.load %arg5[%c0_9, %c0_10] : memref<1x256xf32, #tpu.memory_space<vmem>>, vector<1x256xf32>
    %13 = vector.broadcast %12 : vector<1x256xf32> to vector<8x256xf32>
    %14 = arith.addf %11, %13 : vector<8x256xf32>
    %cst_11 = arith.constant 0.000000e+00 : f32
    %15 = vector.broadcast %cst_11 : f32 to vector<8x256xf32>
    %16 = arith.maximumf %14, %15 : vector<8x256xf32>
    %c0_12 = arith.constant 0 : index
    %c0_13 = arith.constant 0 : index
    %17 = vector.load %arg6[%c0_12, %c0_13] : memref<1x256xf32, #tpu.memory_space<vmem>>, vector<1x256xf32>
    %18 = vector.broadcast %17 : vector<1x256xf32> to vector<8x256xf32>
    %19 = arith.mulf %16, %18 : vector<8x256xf32>
    %cst_14 = arith.constant dense<0.000000e+00> : vector<8xf32>
    %20 = vector.multi_reduction <add>, %19, %cst_14 [1] : vector<8x256xf32> to vector<8xf32>
    %21 = vector.shape_cast %20 : vector<8xf32> to vector<8x1xf32>
    %c0_15 = arith.constant 0 : index
    %c0_16 = arith.constant 0 : index
    %22 = vector.load %arg7[%c0_15, %c0_16] : memref<1x1xf32, #tpu.memory_space<vmem>>, vector<1x1xf32>
    %23 = vector.broadcast %22 : vector<1x1xf32> to vector<8x1xf32>
    %24 = arith.addf %21, %23 : vector<8x1xf32>
    %c0_17 = arith.constant 0 : index
    %c0_18 = arith.constant 0 : index
    %25 = vector.load %arg8[%c0_17, %c0_18] : memref<8x1xf32, #tpu.memory_space<vmem>>, vector<8x1xf32>
    tpu.vector_store %arg8[%c0_17, %c0_18], %24 {strides = array<i32>} : memref<8x1xf32, #tpu.memory_space<vmem>>, vector<8x1xf32>,
    return
  }
  func.func @transform_0(%arg0: i32) -> (i32, i32) {
    %c0_i32 = arith.constant 0 : i32
    %c0_i32_0 = arith.constant 0 : i32
    return %arg0, %c0_i32 : i32, i32
  }
  func.func @transform_1(%arg0: i32) -> (i32, i32) {
    %c0_i32 = arith.constant 0 : i32
    %c0_i32_0 = arith.constant 0 : i32
    %c0_i32_1 = arith.constant 0 : i32
    return %c0_i32, %c0_i32_0 : i32, i32
  }
  func.func @transform_2(%arg0: i32) -> (i32, i32) {
    %c0_i32 = arith.constant 0 : i32
    %c0_i32_0 = arith.constant 0 : i32
    %c0_i32_1 = arith.constant 0 : i32
    return %c0_i32, %c0_i32_0 : i32, i32
  }
  func.func @transform_3(%arg0: i32) -> (i32, i32) {
    %c0_i32 = arith.constant 0 : i32
    %c0_i32_0 = arith.constant 0 : i32
    %c0_i32_1 = arith.constant 0 : i32
    return %c0_i32, %c0_i32_0 : i32, i32
  }
  func.func @transform_4(%arg0: i32) -> (i32, i32) {
    %c0_i32 = arith.constant 0 : i32
    %c0_i32_0 = arith.constant 0 : i32
    %c0_i32_1 = arith.constant 0 : i32
    return %c0_i32, %c0_i32_0 : i32, i32
  }
  func.func @transform_5(%arg0: i32) -> (i32, i32) {
    %c0_i32 = arith.constant 0 : i32
    %c0_i32_0 = arith.constant 0 : i32
    %c0_i32_1 = arith.constant 0 : i32
    return %c0_i32, %c0_i32_0 : i32, i32
  }
  func.func @transform_6(%arg0: i32) -> (i32, i32) {
    %c0_i32 = arith.constant 0 : i32
    %c0_i32_0 = arith.constant 0 : i32
    %c0_i32_1 = arith.constant 0 : i32
    return %c0_i32, %c0_i32_0 : i32, i32
  }
  func.func @transform_7(%arg0: i32) -> (i32, i32) {
    %c0_i32 = arith.constant 0 : i32
    %c0_i32_0 = arith.constant 0 : i32
    return %arg0, %c0_i32 : i32, i32
  }
}

</mosaic_0001>

<bundles_post_ra>
// kernel: mlp_forward.1
= control target key start
LH: loop header
LB: loop body
LE: loop exit
PB: predicated region body
PF: predicated region fallthrough
CT: control target
= control target key end

     0   :  { %s1391_s0 = inlined_call_operand.hbm [shape: f32[8,32], index: 0, kind: input, shape index: {}]   ;;  %s1392_s1 = inlined_call_operand.hbm [shape: bf16[32,640], index: 1, kind: input, shape index: {}]   ;;  %s1393_s2 = inlined_call_operand.vmem [shape: f32[1,640], index: 2, kind: input, shape index: {}]   ;;  %s1394_s3 = inlined_call_operand.hbm [shape: bf16[640,256], index: 3, kind: input, shape index: {}]   ;;  %s1395_s4 = inlined_call_operand.vmem [shape: f32[1,256], index: 4, kind: input, shape index: {}]   ;;  %s1396_s5 = inlined_call_operand.vmem [shape: f32[1,256], index: 5, kind: input, shape index: {}]   ;;  %s1397_s6 = inlined_call_operand.<no memory space> [shape: f32[1,1], index: 6, kind: input, shape index: {}]   ;;  %s1398_s7 = inlined_call_operand.vmem [shape: f32[8,1], index: 7, kind: output, shape index: {}]  }
   0x1   :  { %v12_v0 = vstv %s1397_s6 }
   0x2   :  { %13 = vst [vmem:[#allocation2] sm:$0x1] %v12_v0 }
   0x3   :  { %14 = vsyncpa [#allocation4], 0 }
   0x4   :  { %15 = vsyncpa [#allocation6], 0  ;;  %s1274_s26 = smov [#allocation5]   ;;  %s1204_s30 = scalar_lea.hbm %s1392_s1, 1280 }
   0x5   :  { %s31_s27 = sshll.u32 %s1274_s26, 4  ;;  %p1205_p0 = scmp.ne.s32.totalorder %s1392_s1, %s1204_s30  ;;  %s32_s27 = int_to_ptr.vmem [resolvable:$true] %s31_s27 }
   0x6   :  { %p1208_p1 = scmp.lt.u32.totalorder %s1204_s30, %s1392_s1 }
   0x8   :  { %p1210_p2 = pnand %p1208_p1, %p1205_p0 }
   0xa   :  { %1213 = shalt.err (!%p1210_p2)
}
   0xb   :  { %s1214_s6 = scalar_lea.vmem %s32_s27, 1280  ;;  %p1219_p4 = scmp.lt.s32.totalorder %s32_s27, %s32_s27 }
   0xc   :  { %p1215_p3 = scmp.ne.s32.totalorder %s32_s27, %s1214_s6  ;;  %p1220_p5 = scmp.lt.s32.totalorder %s1214_s6, %s1214_s6 }
   0xe   :  { %p1221_p6 = por %p1220_p5, %p1219_p4 }
  0x10   :  { %p1222_p7 = pnand %p1221_p6, %p1215_p3 }
  0x12   :  { %1225 = shalt.err (!%p1222_p7)
}
  0x13   :  { %s1275_s12 = smov 320   ;;  %s1276_s13 = smov 20  }
  0x14   :  { %37 = dma.hbm_to_vmem [thread:$0]  %s1392_s1, 1280, %s32_s27, [#allocation6], %s1275_s12, %s1275_s12, %s1276_s13  }
  0x15   :  { %s1277_s16 = smov [#allocation3]   ;;  %s1278_s18 = smov [#allocation7]  }
  0x16   :  { %s22_s17 = sshll.u32 %s1277_s16, 4  ;;  %s45_s19 = sshll.u32 %s1278_s18, 4  ;;  %s23_s17 = int_to_ptr.vmem [resolvable:$true] %s22_s17  ;;  %s46_s19 = int_to_ptr.vmem [resolvable:$true] %s45_s19 }
  0x17   :  { %s1226_s22 = scalar_lea.hbm %s1391_s0, 128 }
  0x18   :  { %p1227_p8 = scmp.ne.s32.totalorder %s1391_s0, %s1226_s22  ;;  %p1230_p9 = scmp.lt.u32.totalorder %s1226_s22, %s1391_s0 }
  0x1a   :  { %p1232_p10 = pnand %p1230_p9, %p1227_p8 }
  0x1c   :  { %1235 = shalt.err (!%p1232_p10)
}
  0x1d   :  { %s1236_s1 = scalar_lea.vmem %s23_s17, 128  ;;  %p1241_p12 = scmp.lt.s32.totalorder %s23_s17, %s23_s17 }
  0x1e   :  { %p1237_p11 = scmp.ne.s32.totalorder %s23_s17, %s1236_s1  ;;  %p1242_p13 = scmp.lt.s32.totalorder %s1236_s1, %s1236_s1 }
  0x20   :  { %p1243_p0 = por %p1242_p13, %p1241_p12 }
  0x22   :  { %p1244_p1 = pnand %p1243_p0, %p1237_p11 }
  0x24   :  { %1247 = shalt.err (!%p1244_p1)
}
  0x25   :  { %25 = dma.hbm_to_vmem [thread:$0]  %s1391_s0, 128, %s23_s17, [#allocation4]  }
  0x26   :  { %s1248_s8 = scalar_lea.hbm %s1394_s3, 10240 }
  0x27   :  { %p1249_p2 = scmp.ne.s32.totalorder %s1394_s3, %s1248_s8  ;;  %p1252_p3 = scmp.lt.u32.totalorder %s1248_s8, %s1394_s3 }
  0x29   :  { %p1254_p4 = pnand %p1252_p3, %p1249_p2 }
  0x2b   :  { %1257 = shalt.err (!%p1254_p4)
}
  0x2c   :  { %s1258_s12 = scalar_lea.vmem %s46_s19, 10240  ;;  %p1263_p6 = scmp.lt.s32.totalorder %s46_s19, %s46_s19 }
  0x2d   :  { %p1259_p5 = scmp.ne.s32.totalorder %s46_s19, %s1258_s12  ;;  %p1264_p7 = scmp.lt.s32.totalorder %s1258_s12, %s1258_s12 }
  0x2f   :  { %p1265_p8 = por %p1264_p7, %p1263_p6 }
  0x31   :  { %p1266_p9 = pnand %p1265_p8, %p1259_p5 }
  0x33   :  { %1269 = shalt.err (!%p1266_p9)
}
  0x34   :  { %s1279_s0 = smov 128   ;;  %s1280_s13 = smov 8  }
  0x35   :  { %51 = dma.hbm_to_vmem [thread:$0]  %s1394_s3, 10240, %s46_s19, [#allocation6], %s1279_s0, %s1279_s0, %s1280_s13  }
  0x36   :  { %1270 = dma.done.wait [#allocation4], 128  }
  0x37   :  { %1271 = vsyncadd [#allocation4], 4294967168 }
  0x38   :  { %1272 = dma.done.wait [#allocation6], 11520  }
  0x39   :  { %1273 = vsyncadd [#allocation6], 4294955776  ;;  %v1281_v1 = vmov 0   ;;  %v1070_v2 = vld [vmem:[#allocation5 + $0x4] ss:$20 sps:$4 sm:$0xff]   ;;  %vm161_vm0 = vcmask 261120  }
  0x3a   :  { %197 = vmatprep.mubr.bf16.mxu0 %v1281_v1  ;;  %v1072_v3 = vld [vmem:[#allocation5] ss:$20 sps:$4 sm:$0xff]   ;;  %165 = vmatprep.subr.bf16.mxu0 %v1070_v2  ;;  %v1075_v5 = vld [vmem:[#allocation5 + $0x28] ss:$20 sps:$4 sm:$0xff]   ;;  %v1079_v11 = vld [vmem:[#allocation5 + $0x30] ss:$20 sps:$4 sm:$0xff]  }
  0x3b   :  { %v1073_v4 = vld [vmem:[#allocation5 + $0x2c] ss:$20 sps:$4 sm:$0xff]   ;;  %166 = vmatpush1.bf16.msra.mxu0 %v1072_v3  ;;  %v68_v6 = vld [vmem:[#allocation3] sm:$0xff]  ;;  %v1081_v10 = vld [vmem:[#allocation5 + $0x34] ss:$20 sps:$4 sm:$0xff]   ;;  %v1282_v17 = vmov 0.0  }
  0x3c   :  { %167 = vmatprep.subr.bf16.mxu0 %v1073_v4  ;;  %v1078_v7 = vld [vmem:[#allocation5 + $0xc] ss:$20 sps:$4 sm:$0xff]   ;;  %v69_v8 = vpack.c.bf16 %v68_v6, %v68_v6  ;;  %v1076_v9 = vld [vmem:[#allocation5 + $0x8] ss:$20 sps:$4 sm:$0xff]   ;;  %v1095_v13 = vld [vmem:[#allocation7 + $0x100] ss:$8 sps:$4 sm:$0xff]  }
  0x3d   :  { %v1090_v12 = vld [vmem:[#allocation7 + $0x104] ss:$8 sps:$4 sm:$0xff]   ;;  %v1096_v14 = vld [vmem:[#allocation7 + $0x114] ss:$8 sps:$4 sm:$0xff]   ;;  %v1101_v16 = vld [vmem:[#allocation7 + $0x110] ss:$8 sps:$4 sm:$0xff]  }
  0x3e   :  { %830 = vmatprep.subr.bf16.mxu1 %v1090_v12  ;;  %v1082_v15 = vld [vmem:[#allocation5 + $0x10] ss:$20 sps:$4 sm:$0xff]   ;;  %v1102_v18 = vld [vmem:[#allocation7 + $0x124] ss:$8 sps:$4 sm:$0xff]   ;;  %v1083_v19 = vld [vmem:[#allocation5 + $0x38] ss:$20 sps:$4 sm:$0xff]  }
  0x3f   :  { %168 = vmatpush1.bf16.msra.mxu0 %v1075_v5  ;;  %831 = vmatpush1.bf16.msra.mxu1 %v1095_v13  ;;  %v1107_v20 = vld [vmem:[#allocation7 + $0x120] ss:$8 sps:$4 sm:$0xff]   ;;  %vm1283_vm1 = vmmov 0   ;;  %v1108_v21 = vld [vmem:[#allocation7 + $0x134] ss:$8 sps:$4 sm:$0xff]   ;;  %vm939_vm2 = vcmask 7168  }
  0x40   :  { %206 = vmatprep.subr.bf16.mxu0 %v1078_v7  ;;  %832 = vmatprep.subr.bf16.mxu1 %v1096_v14  ;;  %v1086_v22 = vld [vmem:[#allocation7 + $0x4] ss:$8 sps:$4 sm:$0xff]   ;;  %v1113_v23 = vld [vmem:[#allocation7 + $0x130] ss:$8 sps:$4 sm:$0xff]   ;;  %v1084_v24 = vld [vmem:[#allocation7] ss:$8 sps:$4 sm:$0xff]  }
  0x41   :  { %v1114_v25 = vld [vmem:[#allocation7 + $0x144] ss:$8 sps:$4 sm:$0xff]   ;;  %v1089_v26 = vld [vmem:[#allocation7 + $0x14] ss:$8 sps:$4 sm:$0xff]   ;;  %v1087_v27 = vld [vmem:[#allocation7 + $0x10] ss:$8 sps:$4 sm:$0xff]  }
  0x42   :  { %957 = vmatmul.mubr.msk.bf16.vlgmr.msra.gmra.mrb[0].mxu0 %vm161_vm0, %v69_v8  ;;  %v1119_v28 = vld [vmem:[#allocation7 + $0x140] ss:$8 sps:$4 sm:$0xff]   ;;  %v1120_v29 = vld [vmem:[#allocation7 + $0x154] ss:$8 sps:$4 sm:$0xff]   ;;  %v1094_v30 = vld [vmem:[#allocation7 + $0x24] ss:$8 sps:$4 sm:$0xff]  }
  0x43   :  { %207 = vmatpush1.bf16.msra.mxu0 %v1076_v9  ;;  %238 = vmatprep.mubr.bf16.mxu0 %v1281_v1  ;;  %v1125_v31 = vld [vmem:[#allocation7 + $0x150] ss:$8 sps:$4 sm:$0xff]   ;;  %v1092_v32 = vld [vmem:[#allocation7 + $0x20] ss:$8 sps:$4 sm:$0xff]   ;;  %v1126_v33 = vld [vmem:[#allocation7 + $0x164] ss:$8 sps:$4 sm:$0xff]  }
  0x44   :  { %208 = vmatprep.subr.bf16.mxu0 %v1081_v10  ;;  %833 = vmatpush1.bf16.msra.mxu1 %v1101_v16  ;;  %v1100_v34 = vld [vmem:[#allocation7 + $0x34] ss:$8 sps:$4 sm:$0xff]   ;;  %v1098_v35 = vld [vmem:[#allocation7 + $0x30] ss:$8 sps:$4 sm:$0xff]   ;;  %v1131_v36 = vld [vmem:[#allocation7 + $0x160] ss:$8 sps:$4 sm:$0xff]  }
  0x45   :  { %834 = vmatprep.subr.bf16.mxu1 %v1102_v18  ;;  %v1132_v37 = vld [vmem:[#allocation7 + $0x174] ss:$8 sps:$4 sm:$0xff]   ;;  %v1106_v38 = vld [vmem:[#allocation7 + $0x44] ss:$8 sps:$4 sm:$0xff]   ;;  %v1137_v39 = vld [vmem:[#allocation7 + $0x170] ss:$8 sps:$4 sm:$0xff]  }
  0x46   :  { %v1104_v40 = vld [vmem:[#allocation7 + $0x40] ss:$8 sps:$4 sm:$0xff]   ;;  %v1138_v41 = vld [vmem:[#allocation7 + $0x184] ss:$8 sps:$4 sm:$0xff]   ;;  %v1112_v42 = vld [vmem:[#allocation7 + $0x54] ss:$8 sps:$4 sm:$0xff]  }
  0x47   :  { %209 = vmatpush1.bf16.msra.mxu0 %v1079_v11  ;;  %v1110_v43 = vld [vmem:[#allocation7 + $0x50] ss:$8 sps:$4 sm:$0xff]   ;;  %v1118_v44 = vld [vmem:[#allocation7 + $0x64] ss:$8 sps:$4 sm:$0xff]   ;;  %v1143_v45 = vld [vmem:[#allocation7 + $0x180] ss:$8 sps:$4 sm:$0xff]  }
  0x48   :  { %1044 = vmatprep.subr.bf16.mxu0 %v1282_v17  ;;  %835 = vmatpush1.bf16.msra.mxu1 %v1107_v20  ;;  %v1144_v46 = vld [vmem:[#allocation7 + $0x194] ss:$8 sps:$4 sm:$0xff]   ;;  %v1149_v47 = vld [vmem:[#allocation7 + $0x190] ss:$8 sps:$4 sm:$0xff]   ;;  %v1116_v48 = vld [vmem:[#allocation7 + $0x60] ss:$8 sps:$4 sm:$0xff]  }
  0x49   :  { %836 = vmatprep.subr.bf16.mxu1 %v1108_v21  ;;  %v1150_v49 = vld [vmem:[#allocation7 + $0x1a4] ss:$8 sps:$4 sm:$0xff]   ;;  %v1124_v50 = vld [vmem:[#allocation7 + $0x74] ss:$8 sps:$4 sm:$0xff]   ;;  %v1155_v51 = vld [vmem:[#allocation7 + $0x1a0] ss:$8 sps:$4 sm:$0xff]  }
  0x4a   :  { %958 = vmatmul.mubr.msk.bf16.vlgmr.msra.gmra.mrb[4].mxu0 %vm161_vm0, %v69_v8  ;;  %v1122_v52 = vld [vmem:[#allocation7 + $0x70] ss:$8 sps:$4 sm:$0xff]   ;;  %v1156_v53 = vld [vmem:[#allocation7 + $0x1b4] ss:$8 sps:$4 sm:$0xff]   ;;  %v1130_v54 = vld [vmem:[#allocation7 + $0x84] ss:$8 sps:$4 sm:$0xff]  }
  0x4b   :  { %1045 = vmatpush3.bf16.msra.mxu0 %v1082_v15  ;;  %1048 = vmatprep.mubr.msk.bf16.mxu0 %vm1283_vm1, %v1282_v17  ;;  %v1161_v55 = vld [vmem:[#allocation7 + $0x1b0] ss:$8 sps:$4 sm:$0xff]   ;;  %v1128_v56 = vld [vmem:[#allocation7 + $0x80] ss:$8 sps:$4 sm:$0xff]   ;;  %v1136_v57 = vld [vmem:[#allocation7 + $0x94] ss:$8 sps:$4 sm:$0xff]  }
  0x4c   :  { %1046 = vmatprep.subr.bf16.mxu0 %v1282_v17  ;;  %837 = vmatpush1.bf16.msra.mxu1 %v1113_v23  ;;  %v1134_v58 = vld [vmem:[#allocation7 + $0x90] ss:$8 sps:$4 sm:$0xff]   ;;  %v1142_v59 = vld [vmem:[#allocation7 + $0xa4] ss:$8 sps:$4 sm:$0xff]   ;;  %v1140_v60 = vld [vmem:[#allocation7 + $0xa0] ss:$8 sps:$4 sm:$0xff]   ;;  %v84_v17 = vlaneseq }
  0x4d   :  { %838 = vmatprep.subr.bf16.mxu1 %v1114_v25  ;;  %v1148_v61 = vld [vmem:[#allocation7 + $0xb4] ss:$8 sps:$4 sm:$0xff]   ;;  %v1146_v62 = vld [vmem:[#allocation7 + $0xb0] ss:$8 sps:$4 sm:$0xff]   ;;  %v1154_v63 = vld [vmem:[#allocation7 + $0xc4] ss:$8 sps:$4 sm:$0xff]  }
  0x4e   :  { %v1152_v0 = vld [vmem:[#allocation7 + $0xc0] ss:$8 sps:$4 sm:$0xff]   ;;  %v1160_v2 = vld [vmem:[#allocation7 + $0xd4] ss:$8 sps:$4 sm:$0xff]   ;;  %v1158_v3 = vld [vmem:[#allocation7 + $0xd0] ss:$8 sps:$4 sm:$0xff]  }
  0x4f   :  { %1047 = vmatpush3.bf16.msra.mxu0 %v1083_v19  ;;  %v1162_v4 = vld [vmem:[#allocation7 + $0x1c4] ss:$8 sps:$4 sm:$0xff]   ;;  %v1167_v6 = vld [vmem:[#allocation7 + $0x1c0] ss:$8 sps:$4 sm:$0xff]   ;;  %v1172_v9 = vld [vmem:[#allocation7 + $0xf4] ss:$8 sps:$4 sm:$0xff]  }
  0x50   :  { %789 = vmatprep.subr.bf16.mxu0 %v1086_v22  ;;  %839 = vmatpush1.bf16.msra.mxu1 %v1119_v28  ;;  %v1166_v5 = vld [vmem:[#allocation7 + $0xe4] ss:$8 sps:$4 sm:$0xff]   ;;  %v1164_v7 = vld [vmem:[#allocation7 + $0xe0] ss:$8 sps:$4 sm:$0xff]   ;;  %v1173_v10 = vld [vmem:[#allocation7 + $0x1d0] ss:$8 sps:$4 sm:$0xff]  }
  0x51   :  { %840 = vmatprep.subr.bf16.mxu1 %v1120_v29  ;;  %v1170_v11 = vld [vmem:[#allocation7 + $0xf0] ss:$8 sps:$4 sm:$0xff]   ;;  %v1174_v12 = vld [vmem:[#allocation7 + $0x1e4] ss:$8 sps:$4 sm:$0xff]   ;;  %v1176_v13 = vld [vmem:[#allocation7 + $0x1e0] ss:$8 sps:$4 sm:$0xff]  }
  0x52   :  { %1049 = vmatmul.mubr.msk.bf16.vlgmr.msra.gmra.mrb[8].mxu0 %vm161_vm0, %v69_v8  ;;  %v1168_v8 = vld [vmem:[#allocation7 + $0x1d4] ss:$8 sps:$4 sm:$0xff]   ;;  %v1179_v15 = vld [vmem:[#allocation7 + $0x1f0] ss:$8 sps:$4 sm:$0xff]   ;;  %v1182_v16 = vld [vmem:[#allocation7 + $0x204] ss:$8 sps:$4 sm:$0xff]  }
  0x53   :  { %790 = vmatpush1.bf16.msra.mxu0 %v1084_v24  ;;  %v1177_v14 = vld [vmem:[#allocation7 + $0x1f4] ss:$8 sps:$4 sm:$0xff]   ;;  %v85_v18 = vshrl.u32 %v84_v17, 7  ;;  %v82_v20 = vld [vmem:[%s1393_s2] sm:$0x1f] }
  0x54   :  { %791 = vmatprep.subr.bf16.mxu0 %v1089_v26  ;;  %841 = vmatpush1.bf16.msra.mxu1 %v1125_v31 }
  0x55   :  { %842 = vmatprep.subr.bf16.mxu1 %v1126_v33  ;;  %v1368_v19 = vsub.s32 0, %v85_v18  ;;  %v1373_v21 = vsub.s32 1, %v85_v18 }
  0x57   :  { %792 = vmatpush1.bf16.msra.mxu0 %v1087_v27  ;;  %v87_v22 = vrot.slane %v82_v20, %v1368_v19  ;;  %v91_v23 = vrot.slane %v82_v20, %v1373_v21  ;;  %v94_v27 = vsub.s32 2, %v85_v18 }
  0x58   :  { %793 = vmatprep.subr.bf16.mxu0 %v1094_v30  ;;  %843 = vmatpush1.bf16.msra.mxu1 %v1131_v36  ;;  %v98_v30 = vsub.s32 3, %v85_v18 }
  0x59   :  { %844 = vmatprep.subr.bf16.mxu1 %v1132_v37 }
  0x5a   :  { %v99_v36 = vrot.slane %v82_v20, %v98_v30 }
  0x5b   :  { %794 = vmatpush1.bf16.msra.mxu0 %v1092_v32 }
  0x5c   :  { %795 = vmatprep.subr.bf16.mxu0 %v1100_v34  ;;  %845 = vmatpush1.bf16.msra.mxu1 %v1137_v39  ;;  %v95_v34 = vrot.slane %v82_v20, %v94_v27 }
  0x5d   :  { %846 = vmatprep.subr.bf16.mxu1 %v1138_v41 }
  0x5f   :  { %796 = vmatpush1.bf16.msra.mxu0 %v1098_v35 }
  0x60   :  { %797 = vmatprep.subr.bf16.mxu0 %v1106_v38  ;;  %847 = vmatpush1.bf16.msra.mxu1 %v1143_v45 }
  0x61   :  { %848 = vmatprep.subr.bf16.mxu1 %v1144_v46 }
  0x63   :  { %798 = vmatpush1.bf16.msra.mxu0 %v1104_v40 }
  0x64   :  { %799 = vmatprep.subr.bf16.mxu0 %v1112_v42  ;;  %849 = vmatpush1.bf16.msra.mxu1 %v1149_v47  ;;  %v1180_v47 = vld [vmem:[#allocation7 + $0x200] ss:$8 sps:$4 sm:$0xff]  }
  0x65   :  { %850 = vmatprep.subr.bf16.mxu1 %v1150_v49  ;;  %v1185_v49 = vld [vmem:[#allocation7 + $0x214] ss:$8 sps:$4 sm:$0xff]  }
  0x67   :  { %800 = vmatpush1.bf16.msra.mxu0 %v1110_v43 }
  0x68   :  { %801 = vmatprep.subr.bf16.mxu0 %v1118_v44  ;;  %851 = vmatpush1.bf16.msra.mxu1 %v1155_v51 }
  0x69   :  { %852 = vmatprep.subr.bf16.mxu1 %v1156_v53 }
  0x6b   :  { %802 = vmatpush1.bf16.msra.mxu0 %v1116_v48 }
  0x6c   :  { %803 = vmatprep.subr.bf16.mxu0 %v1124_v50  ;;  %853 = vmatpush1.bf16.msra.mxu1 %v1161_v55 }
  0x6d   :  { %854 = vmatprep.subr.bf16.mxu1 %v1162_v4  ;;  %v1203_v4 = vld [vmem:[#allocation7 + $0x274] ss:$8 sps:$4 sm:$0xff]  }
  0x6f   :  { %804 = vmatpush1.bf16.msra.mxu0 %v1122_v52  ;;  %v1183_v52 = vld [vmem:[#allocation7 + $0x210] ss:$8 sps:$4 sm:$0xff]  }
  0x70   :  { %805 = vmatprep.subr.bf16.mxu0 %v1130_v54  ;;  %855 = vmatpush1.bf16.msra.mxu1 %v1167_v6  ;;  %v1188_v54 = vld [vmem:[#allocation7 + $0x224] ss:$8 sps:$4 sm:$0xff]   ;;  %v1201_v6 = vld [vmem:[#allocation7 + $0x270] ss:$8 sps:$4 sm:$0xff]  }
  0x71   :  { %856 = vmatprep.subr.bf16.mxu1 %v1168_v8 }
  0x73   :  { %806 = vmatpush1.bf16.msra.mxu0 %v1128_v56  ;;  %v1186_v56 = vld [vmem:[#allocation7 + $0x220] ss:$8 sps:$4 sm:$0xff]  }
  0x74   :  { %807 = vmatprep.subr.bf16.mxu0 %v1136_v57  ;;  %857 = vmatpush1.bf16.msra.mxu1 %v1173_v10  ;;  %v1191_v57 = vld [vmem:[#allocation7 + $0x234] ss:$8 sps:$4 sm:$0xff]  }
  0x75   :  { %858 = vmatprep.subr.bf16.mxu1 %v1174_v12  ;;  %v377_v12 = vld [vmem:[%s1395_s4] sm:$0x3] }
  0x77   :  { %808 = vmatpush1.bf16.msra.mxu0 %v1134_v58  ;;  %v1189_v58 = vld [vmem:[#allocation7 + $0x230] ss:$8 sps:$4 sm:$0xff]  }
  0x78   :  { %809 = vmatprep.subr.bf16.mxu0 %v1142_v59  ;;  %859 = vmatpush1.bf16.msra.mxu1 %v1176_v13  ;;  %v1194_v59 = vld [vmem:[#allocation7 + $0x244] ss:$8 sps:$4 sm:$0xff]   ;;  %v382_v13 = vrot.slane %v377_v12, %v1368_v19 }
  0x79   :  { %860 = vmatprep.subr.bf16.mxu1 %v1177_v14  ;;  %v386_v14 = vrot.slane %v377_v12, %v1373_v21 }
  0x7b   :  { %810 = vmatpush1.bf16.msra.mxu0 %v1140_v60  ;;  %v102_v60 = vsub.s32 4, %v85_v18 }
  0x7c   :  { %811 = vmatprep.subr.bf16.mxu0 %v1148_v61  ;;  %861 = vmatpush1.bf16.msra.mxu1 %v1179_v15  ;;  %v1192_v61 = vld [vmem:[#allocation7 + $0x240] ss:$8 sps:$4 sm:$0xff]  }
  0x7d   :  { %871 = vmatprep.subr.bf16.mxu1 %v1182_v16  ;;  %v914_v15 = vld [vmem:[%s1396_s5] sm:$0x3] }
  0x7f   :  { %812 = vmatpush1.bf16.msra.mxu0 %v1146_v62  ;;  %v1197_v62 = vld [vmem:[#allocation7 + $0x254] ss:$8 sps:$4 sm:$0xff]  }
  0x80   :  { %813 = vmatprep.subr.bf16.mxu0 %v1154_v63  ;;  %v103_v63 = vrot.slane %v82_v20, %v102_v60 }
  0x83   :  { %814 = vmatpush1.bf16.msra.mxu0 %v1152_v0  ;;  %v1195_v0 = vld [vmem:[#allocation7 + $0x250] ss:$8 sps:$4 sm:$0xff]  }
  0x84   :  { %815 = vmatprep.subr.bf16.mxu0 %v1160_v2 }
  0x87   :  { %816 = vmatpush1.bf16.msra.mxu0 %v1158_v3  ;;  %v1198_v3 = vld [vmem:[#allocation7 + $0x260] ss:$8 sps:$4 sm:$0xff]  }
  0x88   :  { %817 = vmatprep.subr.bf16.mxu0 %v1166_v5 }
  0x8b   :  { %818 = vmatpush1.bf16.msra.mxu0 %v1164_v7 }
  0x8c   :  { %819 = vmatprep.subr.bf16.mxu0 %v1172_v9 }
  0x8f   :  { %820 = vmatpush1.bf16.msra.mxu0 %v1170_v11 }
 0x115   :  { %v199_v24 = vpop.f32.mrb[0].mxu0 }
 0x116   :  { %v200_v25 = vadd.f32 %v199_v24, %v87_v22  ;;  %v201_v26 = vpop.f32.mrb[1].mxu0 }
 0x117   :  { %v202_v28 = vadd.f32 %v201_v26, %v91_v23  ;;  %v203_v29 = vpop.f32.mrb[2].mxu0  ;;  %v919_v23 = vrot.slane %v914_v15, %v1368_v19  ;;  %v923_v26 = vrot.slane %v914_v15, %v1373_v21 }
 0x118   :  { %v287_v31 = vmax.f32 %v200_v25, 0.0  ;;  %v204_v32 = vpop.f32.mrb[3].mxu0 }
 0x119   :  { %v288_v33 = vmax.f32 %v202_v28, 0.0 }
 0x11a   :  { %v292_v37 = vpack.c.bf16 %v287_v31, %v287_v31 }
 0x11b   :  { %v293_v35 = vpack.c.bf16 %v288_v33, %v288_v33  ;;  %v1040_v33 = vld [vmem:[#allocation2] ss:$0 sm:$0xff] }
 0x11d   :  { %v240_v38 = vpop.f32.mrb[4].mxu0  ;;  %821 = vmatprep.mubr.bf16.mxu0 %v293_v35 }
 0x11e   :  { %v241_v39 = vadd.f32 %v240_v38, %v95_v34  ;;  %v242_v40 = vpop.f32.mrb[5].mxu0  ;;  %822 = vmatmul.mubr.bf16.vlgmr.msra.gmra.mrb[12].mxu0 %v292_v37 }
 0x11f   :  { %v243_v41 = vadd.f32 %v242_v40, %v99_v36  ;;  %v244_v42 = vpop.f32.mrb[6].mxu0 }
 0x120   :  { %v289_v43 = vmax.f32 %v241_v39, 0.0  ;;  %v245_v44 = vpop.f32.mrb[7].mxu0 }
 0x121   :  { %v290_v45 = vmax.f32 %v243_v41, 0.0 }
 0x122   :  { %v294_v48 = vpack.c.bf16 %v289_v43, %v289_v43 }
 0x123   :  { %v295_v46 = vpack.c.bf16 %v290_v45, %v290_v45 }
 0x125   :  { %862 = vmatprep.mubr.bf16.mxu1 %v295_v46  ;;  %v281_v50 = vpop.f32.mrb[8].mxu0 }
 0x126   :  { %863 = vmatmul.mubr.bf16.vlgmr.msra.gmra.mrb[0].mxu1 %v294_v48  ;;  %v1050_v51 = vpop.f32.mrb[9].mxu0  ;;  %v282_v2 = vadd.f32 %v281_v50, %v103_v63 }
 0x127   :  { %872 = vmatpush1.bf16.msra.mxu1 %v1180_v47  ;;  %v284_v53 = vpop.f32.mrb[10].mxu0  ;;  %903 = vmatprep.mubr.bf16.mxu1 %v1281_v1  ;;  %v1200_v1 = vld [vmem:[#allocation7 + $0x264] ss:$8 sps:$4 sm:$0xff]  }
 0x128   :  { %873 = vmatprep.subr.bf16.mxu1 %v1185_v49  ;;  %v1051_v55 = vpop.f32.mrb[11].mxu0  ;;  %v291_v5 = vmax.f32 %v282_v2, 0.0 }
 0x12a   :  { %v296_v7 = vpack.c.bf16 %v291_v5, %v291_v5 }
 0x12b   :  { %874 = vmatpush1.bf16.msra.mxu1 %v1183_v52 }
 0x12c   :  { %875 = vmatprep.subr.bf16.mxu1 %v1188_v54 }
 0x12f   :  { %876 = vmatpush1.bf16.msra.mxu1 %v1186_v56 }
 0x130   :  { %877 = vmatprep.subr.bf16.mxu1 %v1191_v57 }
 0x133   :  { %878 = vmatpush1.bf16.msra.mxu1 %v1189_v58 }
 0x134   :  { %879 = vmatprep.subr.bf16.mxu1 %v1194_v59 }
 0x137   :  { %880 = vmatpush1.bf16.msra.mxu1 %v1192_v61 }
 0x138   :  { %881 = vmatprep.subr.bf16.mxu1 %v1197_v62 }
 0x13b   :  { %882 = vmatpush1.bf16.msra.mxu1 %v1195_v0 }
 0x13c   :  { %883 = vmatprep.subr.bf16.mxu1 %v1200_v1 }
 0x13f   :  { %884 = vmatpush1.bf16.msra.mxu1 %v1198_v3 }
 0x140   :  { %885 = vmatprep.subr.bf16.mxu1 %v1203_v4 }
 0x143   :  { %886 = vmatpush1.bf16.msra.mxu1 %v1201_v6 }
 0x146   :  { %904 = vmatmul.mubr.bf16.vlgmr.msra.gmra.mrb[0].mxu1 %v296_v7 }
 0x1f1   :  { %v823_v8 = vpop.f32.mrb[12].mxu0 }
 0x1f2   :  { %v825_v9 = vpop.f32.mrb[13].mxu0  ;;  %v824_v16 = vadd.f32 %v823_v8, %v382_v13 }
 0x1f3   :  { %v827_v10 = vpop.f32.mrb[14].mxu0  ;;  %v826_v17 = vadd.f32 %v825_v9, %v386_v14 }
 0x1f4   :  { %v828_v11 = vpop.f32.mrb[15].mxu0 }
 0x219   :  { %v905_v18 = vpop.f32.mrb[0].mxu1 }
 0x21a   :  { %v1053_v20 = vadd.f32 %v905_v18, %v824_v16  ;;  %v907_v22 = vpop.f32.mrb[1].mxu1 }
 0x21b   :  { %v1055_v24 = vadd.f32 %v907_v22, %v826_v17  ;;  %v909_v25 = vpop.f32.mrb[2].mxu1 }
 0x21c   :  { %v912_v27 = vmax.f32 %v1053_v20, 0.0  ;;  %v910_v28 = vpop.f32.mrb[3].mxu1 }
 0x21d   :  { %v913_v29 = vmax.f32 %v1055_v24, 0.0 }
 0x21e   :  { %v926_v30 = vmul.f32 %v919_v23, %v912_v27 }
 0x21f   :  { %v927_v31 = vmul.f32 %v923_v26, %v913_v29 }
 0x221   :  { %v928_v32 = vadd.f32 %v927_v31, %v926_v30 }
 0x223   :  { %929 = vadd.xlane.f32.xlu0 %v928_v32 }
 0x2b0   :  { %v930_v34 = vpop.xlane.xlu0 %929 }
 0x2b1   :  { %v938_v35 = vadd.f32 %v1040_v33, %v930_v34 }
 0x2b3   :  { %940 = vst.msk [vmem:[%s1398_s7] sm:$0xff] %vm939_vm2, %v938_v35 }
 0x2b4   :  { %945 = vsyncpa [#allocation4], 1 }
 0x2b5   :  { %946 = vsyncpa [#allocation6], 1 }

</bundles_post_ra>
